<compile_context>
chip_gen: v6e
topology: v6e:2x2x1
jax: 0.10.0
libtpu: 0.0.40
codegen_flags: <defaults>
</compile_context>

<pallas_src>
import math
import functools

import jax
import jax.numpy as jnp
from jax.experimental import pallas as pl
from jax.experimental.pallas import tpu as pltpu

# Module-level constant used by format_channel_size() in the original repo.
EXPANDTIMES = 100.0


def _cdiv(a, b):
    return -(-a // b)


def _pick_row_tile(OH, OW, Cout, max_block_bytes=8 << 20):
    """Output-row tile T_OH.  The flat output block's last dim is T_OH*OW, which
    must be a multiple of 128 (lane-dense, unmasked HBM writeback) unless the
    tile covers all of OH.  Prefer >=2 row tiles per image (pipelining + v7x
    2-TC sharding) while keeping the f32 out block under ~8 MiB."""
    t0 = 128 // math.gcd(OW, 128)
    if t0 >= OH:
        return OH                                    # single tile: block = full dims
    cap_rows = max(max_block_bytes // (Cout * OW * 4), 1)
    t = min((OH // (2 * t0)) * t0, (cap_rows // t0) * t0)
    return max(t, t0)


def _vmem_capacity_bytes():
    try:
        return int(pltpu.get_tpu_info().vmem_capacity_bytes)
    except Exception:
        return 64 * 1024 * 1024                      # conservative (v7x per-TC VMEM)


def _channel_gate(channel_base, channel_controller, out_channels):
    """format_channel_size() from the PyTorch module, in f32."""
    cb = channel_base.astype(jnp.float32)
    channel_p = jax.nn.softmax(cb, axis=1)                               # (1, Cout)
    tril = jnp.tril(jnp.ones((out_channels, out_channels), jnp.float32))
    channel_score = channel_p @ tril
    zeroed = channel_score - jax.nn.sigmoid(channel_controller.astype(jnp.float32))
    return jax.nn.sigmoid(zeroed * EXPANDTIMES)                          # (1, Cout)


@functools.partial(jax.jit, static_argnames=("stride", "padding", "compute_dtype"))
def soft_channel_conv2d(x, weight, channel_base, channel_controller,
                        stride=1, padding=0, compute_dtype=jnp.float32):
    """x: (N, Cin, H, W) f32; weight: (Cout, Cin, K, K) f32.  Forward pass of
    SoftChannelConv2d: conv2d (no bias) * sigmoid channel gate.
    compute_dtype=jnp.bfloat16 halves the dominant x HBM stream (accumulation
    stays f32); default f32 for exact parity with the reference."""
    # TODO(synk): groups > 1 not supported (module default is groups=1).
    N, Cin, H, W = x.shape
    Cout, _, K, _ = weight.shape

    Hp = H + 2 * padding
    Wp = W + 2 * padding
    OH = (Hp - K) // stride + 1
    OW = (Wp - K) // stride + 1

    T_OH = _pick_row_tile(OH, OW, Cout)
    R = _cdiv(OH, T_OH)
    span = (T_OH - 1) * Wp + OW          # flat-pixel width of one row tile (incl. garbage cols)

    # Bottom zero-padding so the last (kh, kw)-shifted slice stays in bounds
    # (also covers the garbage rows of a ragged last row tile).
    start_max = ((R - 1) * T_OH * stride + K - 1) * Wp + (K - 1)
    last_elem = start_max + (span - 1) * stride
    Hp2 = max(Hp, _cdiv(last_elem + 1, Wp))
    pad_bottom = Hp2 - Hp

    if padding or pad_bottom:
        x = jnp.pad(x, ((0, 0), (0, 0),
                        (padding, padding + pad_bottom),
                        (padding, padding)))
    x_flat = x.reshape(N, Cin, Hp2 * Wp).astype(compute_dtype)   # free reshape (row-major)

    # ---- channel gate folded into the weight (linear -> exactly equivalent) ----
    gate = _channel_gate(channel_base, channel_controller, Cout)         # (1, Cout)
    w_scaled = weight.astype(jnp.float32) * gate.reshape(Cout, 1, 1, 1)
    # (Cout, Cin, K, K) -> (K*K, Cout, Cin), tap index kk = kh*K + kw.
    w_r = jnp.transpose(w_scaled, (2, 3, 0, 1)).reshape(K * K, Cout, Cin)
    w_r = w_r.astype(compute_dtype)

    def kernel(x_ref, w_ref, out_ref):
        # x_ref  : (1, Cin, Hp2*Wp)   whole padded image, resident across row tiles
        # w_ref  : (K*K, Cout, Cin)   gate-folded weight, grid-resident
        # out_ref: (1, Cout, T_OH*OW) flat NCHW output tile (lane-dense writeback)
        if R == 1:
            row0 = 0                                   # static fast path (small images)
        else:
            row0 = pl.program_id(1) * T_OH             # output-row offset of this tile
        acc = jnp.zeros((Cout, span), jnp.float32)
        for kh in range(K):
            for kw in range(K):
                start = (row0 * stride + kh) * Wp + kw
                if stride == 1:
                    xs = x_ref[0, :, pl.ds(start, span)]             # (Cin, span)
                else:
                    # TODO(synk): strided lane loads are untested at scale; demo is stride=1.
                    xs = x_ref[0, :, pl.ds(start, span, stride=stride)]
                acc = acc + jnp.dot(w_ref[kh * K + kw], xs,
                                    preferred_element_type=jnp.float32)
        # Keep only the OW valid columns of every output row (drop the K-1
        # wrap-around garbage columns).  The HBM writeback of the whole block
        # remains one contiguous lane-dense slab.
        for oh in range(T_OH):
            out_ref[0, :, pl.ds(oh * OW, OW)] = (
                acc[:, oh * Wp: oh * Wp + OW].astype(out_ref.dtype))

    # ---- VMEM budget (per-generation, from the actual device) ----
    in_item = jnp.dtype(compute_dtype).itemsize
    img_bytes = max(Cin, 8) * Hp2 * Wp * in_item        # sublane-padded, double-buffered below
    outblk_bytes = max(Cout, 8) * T_OH * OW * 4
    vmem_need = 2 * img_bytes + 2 * outblk_bytes + (4 << 20)
    vmem_cap = _vmem_capacity_bytes()
    vmem_limit = int(min(vmem_cap * 0.9, max(2 * vmem_need, 32 << 20)))
    # TODO(synk): if 2*img_bytes alone approaches vmem_cap (very large images),
    # switch to a halo'd row slab streamed manually with pltpu.make_async_copy
    # (memory_space=pl.ANY) instead of keeping the whole image resident.

    out_flat = pl.pallas_call(
        kernel,
        out_shape=jax.ShapeDtypeStruct((N, Cout, OH * OW), jnp.float32),
        grid_spec=pltpu.PrefetchScalarGridSpec(
            num_scalar_prefetch=0,
            grid=(N, R),
            in_specs=[
                pl.BlockSpec((1, Cin, Hp2 * Wp), lambda n, r: (n, 0, 0)),   # image (per n)
                pl.BlockSpec((K * K, Cout, Cin), lambda n, r: (0, 0, 0)),   # weight (resident)
            ],
            out_specs=pl.BlockSpec((1, Cout, T_OH * OW), lambda n, r: (n, 0, r)),
        ),
        compiler_params=pltpu.CompilerParams(
            dimension_semantics=("parallel", "parallel"),   # n and row-tile axes
            vmem_limit_bytes=vmem_limit,
        ),
    )(x_flat, w_r)

    return out_flat.reshape(N, Cout, OH, OW)                # free row-major split


def _reference(x, weight, channel_base, channel_controller, stride=1, padding=0):
    """Pure-JAX reference matching the PyTorch forward."""
    y = jax.lax.conv_general_dilated(
        x, weight, window_strides=(stride, stride),
        padding=[(padding, padding), (padding, padding)],
        dimension_numbers=("NCHW", "OIHW", "NCHW"))
    Cout = weight.shape[0]
    channel_p = jax.nn.softmax(channel_base, axis=1)
    channel_score = channel_p @ jnp.tril(jnp.ones((Cout, Cout), jnp.float32))
    zeroed = channel_score - jax.nn.sigmoid(channel_controller)
    channel_size = jax.nn.sigmoid(zeroed * EXPANDTIMES)      # (1, Cout)
    return y * channel_size[:, :, None, None]


if __name__ == "__main__":
    # SoftChannelConv2d(in_channels=4, out_channels=8, kernel_size=3,
    #                   stride=1, padding=0, bias=False, groups=1)
    N, Cin, Hs, Ws = 2, 4, 16, 16
    Cout, K = 8, 3
    stride, padding = 1, 0

    key = jax.random.PRNGKey(0)
    kx, kw, kb, kc = jax.random.split(key, 4)

    # kaiming_uniform_(a=sqrt(5)) -> Uniform(-1/sqrt(fan_in), 1/sqrt(fan_in))
    fan_in = Cin * K * K
    bound = 1.0 / math.sqrt(fan_in)
    weight = jax.random.uniform(kw, (Cout, Cin, K, K), jnp.float32, -bound, bound)
    channel_base = jax.random.uniform(kb, (1, Cout), jnp.float32, -1.0, 1.0)
    channel_controller = jax.random.uniform(kc, (1,), jnp.float32, -1.0, 1.0)
    x = jax.random.normal(kx, (N, Cin, Hs, Ws), jnp.float32)

    out = soft_channel_conv2d(x, weight, channel_base, channel_controller,
                              stride=stride, padding=padding)
    out = jax.block_until_ready(out)

    ref = _reference(x, weight, channel_base, channel_controller,
                     stride=stride, padding=padding)
    assert out.shape == (N, Cout, Hs - K + 1, Ws - K + 1), out.shape
    assert jnp.allclose(out, ref, atol=1e-4, rtol=1e-4), "mismatch vs reference"

    print("KERNEL_OK")
</pallas_src>

<mosaic_0001>
module attributes {stable_mosaic.version = 11 : i64} {
  func.func @kernel(%arg0: i32, %arg1: i32, %arg2: memref<1x4x256xf32, #tpu.memory_space<vmem>>, %arg3: memref<9x8x4xf32, #tpu.memory_space<vmem>>, %arg4: memref<1x8x196xf32, #tpu.memory_space<vmem>>) attributes {dimension_semantics = [#tpu.dimension_semantics<parallel>, #tpu.dimension_semantics<parallel>], iteration_bounds = array<i64: 2, 1>, scalar_prefetch = 0 : i64, scratch_operands = 0 : i64, tpu.core_type = #tpu.core_type<tc>, window_params = [{transform_indices = @transform_0, window_bounds = array<i64: 1, 4, 256>}, {pipeline_mode = #tpu.pipeline_mode<synchronous>, transform_indices = @transform_1, window_bounds = array<i64: 9, 8, 4>}, {transform_indices = @transform_2, window_bounds = array<i64: 1, 8, 196>}]} {
    %cst = arith.constant 0.000000e+00 : f32
    %0 = vector.broadcast %cst : f32 to vector<8x222xf32>
    %c0 = arith.constant 0 : index
    %c0_0 = arith.constant 0 : index
    %c0_1 = arith.constant 0 : index
    %1 = vector.load %arg2[%c0, %c0_0, %c0_1] : memref<1x4x256xf32, #tpu.memory_space<vmem>>, vector<1x4x222xf32>
    %2 = vector.shape_cast %1 : vector<1x4x222xf32> to vector<4x222xf32>
    %c0_2 = arith.constant 0 : index
    %c0_3 = arith.constant 0 : index
    %c0_4 = arith.constant 0 : index
    %3 = vector.load %arg3[%c0_2, %c0_3, %c0_4] : memref<9x8x4xf32, #tpu.memory_space<vmem>>, vector<1x8x4xf32>
    %4 = vector.shape_cast %3 : vector<1x8x4xf32> to vector<8x4xf32>
    %cst_5 = arith.constant dense<0.000000e+00> : vector<8x222xf32>
    %5 = tpu.matmul %4, %2, %cst_5 {dimension_numbers = #tpu.dot_dimension_numbers<[1], [0], [0], [1], [0, 0, 1, 1], [], []>} : vector<8x4xf32>, vector<4x222xf32>, vector<8x222xf32> -> vector<8x222xf32>
    %6 = arith.addf %0, %5 : vector<8x222xf32>
    %c0_6 = arith.constant 0 : index
    %c0_7 = arith.constant 0 : index
    %c1 = arith.constant 1 : index
    %7 = vector.load %arg2[%c0_6, %c0_7, %c1] : memref<1x4x256xf32, #tpu.memory_space<vmem>>, vector<1x4x222xf32>
    %8 = vector.shape_cast %7 : vector<1x4x222xf32> to vector<4x222xf32>
    %c1_8 = arith.constant 1 : index
    %c0_9 = arith.constant 0 : index
    %c0_10 = arith.constant 0 : index
    %9 = vector.load %arg3[%c1_8, %c0_9, %c0_10] : memref<9x8x4xf32, #tpu.memory_space<vmem>>, vector<1x8x4xf32>
    %10 = vector.shape_cast %9 : vector<1x8x4xf32> to vector<8x4xf32>
    %cst_11 = arith.constant dense<0.000000e+00> : vector<8x222xf32>
    %11 = tpu.matmul %10, %8, %cst_11 {dimension_numbers = #tpu.dot_dimension_numbers<[1], [0], [0], [1], [0, 0, 1, 1], [], []>} : vector<8x4xf32>, vector<4x222xf32>, vector<8x222xf32> -> vector<8x222xf32>
    %12 = arith.addf %6, %11 : vector<8x222xf32>
    %c0_12 = arith.constant 0 : index
    %c0_13 = arith.constant 0 : index
    %c2 = arith.constant 2 : index
    %13 = vector.load %arg2[%c0_12, %c0_13, %c2] : memref<1x4x256xf32, #tpu.memory_space<vmem>>, vector<1x4x222xf32>
    %14 = vector.shape_cast %13 : vector<1x4x222xf32> to vector<4x222xf32>
    %c2_14 = arith.constant 2 : index
    %c0_15 = arith.constant 0 : index
    %c0_16 = arith.constant 0 : index
    %15 = vector.load %arg3[%c2_14, %c0_15, %c0_16] : memref<9x8x4xf32, #tpu.memory_space<vmem>>, vector<1x8x4xf32>
    %16 = vector.shape_cast %15 : vector<1x8x4xf32> to vector<8x4xf32>
    %cst_17 = arith.constant dense<0.000000e+00> : vector<8x222xf32>
    %17 = tpu.matmul %16, %14, %cst_17 {dimension_numbers = #tpu.dot_dimension_numbers<[1], [0], [0], [1], [0, 0, 1, 1], [], []>} : vector<8x4xf32>, vector<4x222xf32>, vector<8x222xf32> -> vector<8x222xf32>
    %18 = arith.addf %12, %17 : vector<8x222xf32>
    %c0_18 = arith.constant 0 : index
    %c0_19 = arith.constant 0 : index
    %c16 = arith.constant 16 : index
    %19 = vector.load %arg2[%c0_18, %c0_19, %c16] : memref<1x4x256xf32, #tpu.memory_space<vmem>>, vector<1x4x222xf32>
    %20 = vector.shape_cast %19 : vector<1x4x222xf32> to vector<4x222xf32>
    %c3 = arith.constant 3 : index
    %c0_20 = arith.constant 0 : index
    %c0_21 = arith.constant 0 : index
    %21 = vector.load %arg3[%c3, %c0_20, %c0_21] : memref<9x8x4xf32, #tpu.memory_space<vmem>>, vector<1x8x4xf32>
    %22 = vector.shape_cast %21 : vector<1x8x4xf32> to vector<8x4xf32>
    %cst_22 = arith.constant dense<0.000000e+00> : vector<8x222xf32>
    %23 = tpu.matmul %22, %20, %cst_22 {dimension_numbers = #tpu.dot_dimension_numbers<[1], [0], [0], [1], [0, 0, 1, 1], [], []>} : vector<8x4xf32>, vector<4x222xf32>, vector<8x222xf32> -> vector<8x222xf32>
    %24 = arith.addf %18, %23 : vector<8x222xf32>
    %c0_23 = arith.constant 0 : index
    %c0_24 = arith.constant 0 : index
    %c17 = arith.constant 17 : index
    %25 = vector.load %arg2[%c0_23, %c0_24, %c17] : memref<1x4x256xf32, #tpu.memory_space<vmem>>, vector<1x4x222xf32>
    %26 = vector.shape_cast %25 : vector<1x4x222xf32> to vector<4x222xf32>
    %c4 = arith.constant 4 : index
    %c0_25 = arith.constant 0 : index
    %c0_26 = arith.constant 0 : index
    %27 = vector.load %arg3[%c4, %c0_25, %c0_26] : memref<9x8x4xf32, #tpu.memory_space<vmem>>, vector<1x8x4xf32>
    %28 = vector.shape_cast %27 : vector<1x8x4xf32> to vector<8x4xf32>
    %cst_27 = arith.constant dense<0.000000e+00> : vector<8x222xf32>
    %29 = tpu.matmul %28, %26, %cst_27 {dimension_numbers = #tpu.dot_dimension_numbers<[1], [0], [0], [1], [0, 0, 1, 1], [], []>} : vector<8x4xf32>, vector<4x222xf32>, vector<8x222xf32> -> vector<8x222xf32>
    %30 = arith.addf %24, %29 : vector<8x222xf32>
    %c0_28 = arith.constant 0 : index
    %c0_29 = arith.constant 0 : index
    %c18 = arith.constant 18 : index
    %31 = vector.load %arg2[%c0_28, %c0_29, %c18] : memref<1x4x256xf32, #tpu.memory_space<vmem>>, vector<1x4x222xf32>
    %32 = vector.shape_cast %31 : vector<1x4x222xf32> to vector<4x222xf32>
    %c5 = arith.constant 5 : index
    %c0_30 = arith.constant 0 : index
    %c0_31 = arith.constant 0 : index
    %33 = vector.load %arg3[%c5, %c0_30, %c0_31] : memref<9x8x4xf32, #tpu.memory_space<vmem>>, vector<1x8x4xf32>
    %34 = vector.shape_cast %33 : vector<1x8x4xf32> to vector<8x4xf32>
    %cst_32 = arith.constant dense<0.000000e+00> : vector<8x222xf32>
    %35 = tpu.matmul %34, %32, %cst_32 {dimension_numbers = #tpu.dot_dimension_numbers<[1], [0], [0], [1], [0, 0, 1, 1], [], []>} : vector<8x4xf32>, vector<4x222xf32>, vector<8x222xf32> -> vector<8x222xf32>
    %36 = arith.addf %30, %35 : vector<8x222xf32>
    %c0_33 = arith.constant 0 : index
    %c0_34 = arith.constant 0 : index
    %c32 = arith.constant 32 : index
    %37 = vector.load %arg2[%c0_33, %c0_34, %c32] : memref<1x4x256xf32, #tpu.memory_space<vmem>>, vector<1x4x222xf32>
    %38 = vector.shape_cast %37 : vector<1x4x222xf32> to vector<4x222xf32>
    %c6 = arith.constant 6 : index
    %c0_35 = arith.constant 0 : index
    %c0_36 = arith.constant 0 : index
    %39 = vector.load %arg3[%c6, %c0_35, %c0_36] : memref<9x8x4xf32, #tpu.memory_space<vmem>>, vector<1x8x4xf32>
    %40 = vector.shape_cast %39 : vector<1x8x4xf32> to vector<8x4xf32>
    %cst_37 = arith.constant dense<0.000000e+00> : vector<8x222xf32>
    %41 = tpu.matmul %40, %38, %cst_37 {dimension_numbers = #tpu.dot_dimension_numbers<[1], [0], [0], [1], [0, 0, 1, 1], [], []>} : vector<8x4xf32>, vector<4x222xf32>, vector<8x222xf32> -> vector<8x222xf32>
    %42 = arith.addf %36, %41 : vector<8x222xf32>
    %c0_38 = arith.constant 0 : index
    %c0_39 = arith.constant 0 : index
    %c33 = arith.constant 33 : index
    %43 = vector.load %arg2[%c0_38, %c0_39, %c33] : memref<1x4x256xf32, #tpu.memory_space<vmem>>, vector<1x4x222xf32>
    %44 = vector.shape_cast %43 : vector<1x4x222xf32> to vector<4x222xf32>
    %c7 = arith.constant 7 : index
    %c0_40 = arith.constant 0 : index
    %c0_41 = arith.constant 0 : index
    %45 = vector.load %arg3[%c7, %c0_40, %c0_41] : memref<9x8x4xf32, #tpu.memory_space<vmem>>, vector<1x8x4xf32>
    %46 = vector.shape_cast %45 : vector<1x8x4xf32> to vector<8x4xf32>
    %cst_42 = arith.constant dense<0.000000e+00> : vector<8x222xf32>
    %47 = tpu.matmul %46, %44, %cst_42 {dimension_numbers = #tpu.dot_dimension_numbers<[1], [0], [0], [1], [0, 0, 1, 1], [], []>} : vector<8x4xf32>, vector<4x222xf32>, vector<8x222xf32> -> vector<8x222xf32>
    %48 = arith.addf %42, %47 : vector<8x222xf32>
    %c0_43 = arith.constant 0 : index
    %c0_44 = arith.constant 0 : index
    %c34 = arith.constant 34 : index
    %49 = vector.load %arg2[%c0_43, %c0_44, %c34] : memref<1x4x256xf32, #tpu.memory_space<vmem>>, vector<1x4x222xf32>
    %50 = vector.shape_cast %49 : vector<1x4x222xf32> to vector<4x222xf32>
    %c8 = arith.constant 8 : index
    %c0_45 = arith.constant 0 : index
    %c0_46 = arith.constant 0 : index
    %51 = vector.load %arg3[%c8, %c0_45, %c0_46] : memref<9x8x4xf32, #tpu.memory_space<vmem>>, vector<1x8x4xf32>
    %52 = vector.shape_cast %51 : vector<1x8x4xf32> to vector<8x4xf32>
    %cst_47 = arith.constant dense<0.000000e+00> : vector<8x222xf32>
    %53 = tpu.matmul %52, %50, %cst_47 {dimension_numbers = #tpu.dot_dimension_numbers<[1], [0], [0], [1], [0, 0, 1, 1], [], []>} : vector<8x4xf32>, vector<4x222xf32>, vector<8x222xf32> -> vector<8x222xf32>
    %54 = arith.addf %48, %53 : vector<8x222xf32>
    %55 = vector.extract_strided_slice %54 {offsets = [0, 0], sizes = [8, 14], strides = [1, 1]} : vector<8x222xf32> to vector<8x14xf32>
    %c0_48 = arith.constant 0 : index
    %c0_49 = arith.constant 0 : index
    %c0_50 = arith.constant 0 : index
    %56 = vector.load %arg4[%c0_48, %c0_49, %c0_50] : memref<1x8x196xf32, #tpu.memory_space<vmem>>, vector<1x8x14xf32>
    %57 = vector.shape_cast %56 : vector<1x8x14xf32> to vector<8x14xf32>
    %58 = vector.shape_cast %55 : vector<8x14xf32> to vector<1x8x14xf32>
    tpu.vector_store %arg4[%c0_48, %c0_49, %c0_50], %58 {strides = array<i32>} : memref<1x8x196xf32, #tpu.memory_space<vmem>>, vector<1x8x14xf32>,
    %59 = vector.extract_strided_slice %54 {offsets = [0, 16], sizes = [8, 14], strides = [1, 1]} : vector<8x222xf32> to vector<8x14xf32>
    %c0_51 = arith.constant 0 : index
    %c0_52 = arith.constant 0 : index
    %c14 = arith.constant 14 : index
    %60 = vector.load %arg4[%c0_51, %c0_52, %c14] : memref<1x8x196xf32, #tpu.memory_space<vmem>>, vector<1x8x14xf32>
    %61 = vector.shape_cast %60 : vector<1x8x14xf32> to vector<8x14xf32>
    %62 = vector.shape_cast %59 : vector<8x14xf32> to vector<1x8x14xf32>
    tpu.vector_store %arg4[%c0_51, %c0_52, %c14], %62 {strides = array<i32>} : memref<1x8x196xf32, #tpu.memory_space<vmem>>, vector<1x8x14xf32>,
    %63 = vector.extract_strided_slice %54 {offsets = [0, 32], sizes = [8, 14], strides = [1, 1]} : vector<8x222xf32> to vector<8x14xf32>
    %c0_53 = arith.constant 0 : index
    %c0_54 = arith.constant 0 : index
    %c28 = arith.constant 28 : index
    %64 = vector.load %arg4[%c0_53, %c0_54, %c28] : memref<1x8x196xf32, #tpu.memory_space<vmem>>, vector<1x8x14xf32>
    %65 = vector.shape_cast %64 : vector<1x8x14xf32> to vector<8x14xf32>
    %66 = vector.shape_cast %63 : vector<8x14xf32> to vector<1x8x14xf32>
    tpu.vector_store %arg4[%c0_53, %c0_54, %c28], %66 {strides = array<i32>} : memref<1x8x196xf32, #tpu.memory_space<vmem>>, vector<1x8x14xf32>,
    %67 = vector.extract_strided_slice %54 {offsets = [0, 48], sizes = [8, 14], strides = [1, 1]} : vector<8x222xf32> to vector<8x14xf32>
    %c0_55 = arith.constant 0 : index
    %c0_56 = arith.constant 0 : index
    %c42 = arith.constant 42 : index
    %68 = vector.load %arg4[%c0_55, %c0_56, %c42] : memref<1x8x196xf32, #tpu.memory_space<vmem>>, vector<1x8x14xf32>
    %69 = vector.shape_cast %68 : vector<1x8x14xf32> to vector<8x14xf32>
    %70 = vector.shape_cast %67 : vector<8x14xf32> to vector<1x8x14xf32>
    tpu.vector_store %arg4[%c0_55, %c0_56, %c42], %70 {strides = array<i32>} : memref<1x8x196xf32, #tpu.memory_space<vmem>>, vector<1x8x14xf32>,
    %71 = vector.extract_strided_slice %54 {offsets = [0, 64], sizes = [8, 14], strides = [1, 1]} : vector<8x222xf32> to vector<8x14xf32>
    %c0_57 = arith.constant 0 : index
    %c0_58 = arith.constant 0 : index
    %c56 = arith.constant 56 : index
    %72 = vector.load %arg4[%c0_57, %c0_58, %c56] : memref<1x8x196xf32, #tpu.memory_space<vmem>>, vector<1x8x14xf32>
    %73 = vector.shape_cast %72 : vector<1x8x14xf32> to vector<8x14xf32>
    %74 = vector.shape_cast %71 : vector<8x14xf32> to vector<1x8x14xf32>
    tpu.vector_store %arg4[%c0_57, %c0_58, %c56], %74 {strides = array<i32>} : memref<1x8x196xf32, #tpu.memory_space<vmem>>, vector<1x8x14xf32>,
    %75 = vector.extract_strided_slice %54 {offsets = [0, 80], sizes = [8, 14], strides = [1, 1]} : vector<8x222xf32> to vector<8x14xf32>
    %c0_59 = arith.constant 0 : index
    %c0_60 = arith.constant 0 : index
    %c70 = arith.constant 70 : index
    %76 = vector.load %arg4[%c0_59, %c0_60, %c70] : memref<1x8x196xf32, #tpu.memory_space<vmem>>, vector<1x8x14xf32>
    %77 = vector.shape_cast %76 : vector<1x8x14xf32> to vector<8x14xf32>
    %78 = vector.shape_cast %75 : vector<8x14xf32> to vector<1x8x14xf32>
    tpu.vector_store %arg4[%c0_59, %c0_60, %c70], %78 {strides = array<i32>} : memref<1x8x196xf32, #tpu.memory_space<vmem>>, vector<1x8x14xf32>,
    %79 = vector.extract_strided_slice %54 {offsets = [0, 96], sizes = [8, 14], strides = [1, 1]} : vector<8x222xf32> to vector<8x14xf32>
    %c0_61 = arith.constant 0 : index
    %c0_62 = arith.constant 0 : index
    %c84 = arith.constant 84 : index
    %80 = vector.load %arg4[%c0_61, %c0_62, %c84] : memref<1x8x196xf32, #tpu.memory_space<vmem>>, vector<1x8x14xf32>
    %81 = vector.shape_cast %80 : vector<1x8x14xf32> to vector<8x14xf32>
    %82 = vector.shape_cast %79 : vector<8x14xf32> to vector<1x8x14xf32>
    tpu.vector_store %arg4[%c0_61, %c0_62, %c84], %82 {strides = array<i32>} : memref<1x8x196xf32, #tpu.memory_space<vmem>>, vector<1x8x14xf32>,
    %83 = vector.extract_strided_slice %54 {offsets = [0, 112], sizes = [8, 14], strides = [1, 1]} : vector<8x222xf32> to vector<8x14xf32>
    %c0_63 = arith.constant 0 : index
    %c0_64 = arith.constant 0 : index
    %c98 = arith.constant 98 : index
    %84 = vector.load %arg4[%c0_63, %c0_64, %c98] : memref<1x8x196xf32, #tpu.memory_space<vmem>>, vector<1x8x14xf32>
    %85 = vector.shape_cast %84 : vector<1x8x14xf32> to vector<8x14xf32>
    %86 = vector.shape_cast %83 : vector<8x14xf32> to vector<1x8x14xf32>
    tpu.vector_store %arg4[%c0_63, %c0_64, %c98], %86 {strides = array<i32>} : memref<1x8x196xf32, #tpu.memory_space<vmem>>, vector<1x8x14xf32>,
    %87 = vector.extract_strided_slice %54 {offsets = [0, 128], sizes = [8, 14], strides = [1, 1]} : vector<8x222xf32> to vector<8x14xf32>
    %c0_65 = arith.constant 0 : index
    %c0_66 = arith.constant 0 : index
    %c112 = arith.constant 112 : index
    %88 = vector.load %arg4[%c0_65, %c0_66, %c112] : memref<1x8x196xf32, #tpu.memory_space<vmem>>, vector<1x8x14xf32>
    %89 = vector.shape_cast %88 : vector<1x8x14xf32> to vector<8x14xf32>
    %90 = vector.shape_cast %87 : vector<8x14xf32> to vector<1x8x14xf32>
    tpu.vector_store %arg4[%c0_65, %c0_66, %c112], %90 {strides = array<i32>} : memref<1x8x196xf32, #tpu.memory_space<vmem>>, vector<1x8x14xf32>,
    %91 = vector.extract_strided_slice %54 {offsets = [0, 144], sizes = [8, 14], strides = [1, 1]} : vector<8x222xf32> to vector<8x14xf32>
    %c0_67 = arith.constant 0 : index
    %c0_68 = arith.constant 0 : index
    %c126 = arith.constant 126 : index
    %92 = vector.load %arg4[%c0_67, %c0_68, %c126] : memref<1x8x196xf32, #tpu.memory_space<vmem>>, vector<1x8x14xf32>
    %93 = vector.shape_cast %92 : vector<1x8x14xf32> to vector<8x14xf32>
    %94 = vector.shape_cast %91 : vector<8x14xf32> to vector<1x8x14xf32>
    tpu.vector_store %arg4[%c0_67, %c0_68, %c126], %94 {strides = array<i32>} : memref<1x8x196xf32, #tpu.memory_space<vmem>>, vector<1x8x14xf32>,
    %95 = vector.extract_strided_slice %54 {offsets = [0, 160], sizes = [8, 14], strides = [1, 1]} : vector<8x222xf32> to vector<8x14xf32>
    %c0_69 = arith.constant 0 : index
    %c0_70 = arith.constant 0 : index
    %c140 = arith.constant 140 : index
    %96 = vector.load %arg4[%c0_69, %c0_70, %c140] : memref<1x8x196xf32, #tpu.memory_space<vmem>>, vector<1x8x14xf32>
    %97 = vector.shape_cast %96 : vector<1x8x14xf32> to vector<8x14xf32>
    %98 = vector.shape_cast %95 : vector<8x14xf32> to vector<1x8x14xf32>
    tpu.vector_store %arg4[%c0_69, %c0_70, %c140], %98 {strides = array<i32>} : memref<1x8x196xf32, #tpu.memory_space<vmem>>, vector<1x8x14xf32>,
    %99 = vector.extract_strided_slice %54 {offsets = [0, 176], sizes = [8, 14], strides = [1, 1]} : vector<8x222xf32> to vector<8x14xf32>
    %c0_71 = arith.constant 0 : index
    %c0_72 = arith.constant 0 : index
    %c154 = arith.constant 154 : index
    %100 = vector.load %arg4[%c0_71, %c0_72, %c154] : memref<1x8x196xf32, #tpu.memory_space<vmem>>, vector<1x8x14xf32>
    %101 = vector.shape_cast %100 : vector<1x8x14xf32> to vector<8x14xf32>
    %102 = vector.shape_cast %99 : vector<8x14xf32> to vector<1x8x14xf32>
    tpu.vector_store %arg4[%c0_71, %c0_72, %c154], %102 {strides = array<i32>} : memref<1x8x196xf32, #tpu.memory_space<vmem>>, vector<1x8x14xf32>,
    %103 = vector.extract_strided_slice %54 {offsets = [0, 192], sizes = [8, 14], strides = [1, 1]} : vector<8x222xf32> to vector<8x14xf32>
    %c0_73 = arith.constant 0 : index
    %c0_74 = arith.constant 0 : index
    %c168 = arith.constant 168 : index
    %104 = vector.load %arg4[%c0_73, %c0_74, %c168] : memref<1x8x196xf32, #tpu.memory_space<vmem>>, vector<1x8x14xf32>
    %105 = vector.shape_cast %104 : vector<1x8x14xf32> to vector<8x14xf32>
    %106 = vector.shape_cast %103 : vector<8x14xf32> to vector<1x8x14xf32>
    tpu.vector_store %arg4[%c0_73, %c0_74, %c168], %106 {strides = array<i32>} : memref<1x8x196xf32, #tpu.memory_space<vmem>>, vector<1x8x14xf32>,
    %107 = vector.extract_strided_slice %54 {offsets = [0, 208], sizes = [8, 14], strides = [1, 1]} : vector<8x222xf32> to vector<8x14xf32>
    %c0_75 = arith.constant 0 : index
    %c0_76 = arith.constant 0 : index
    %c182 = arith.constant 182 : index
    %108 = vector.load %arg4[%c0_75, %c0_76, %c182] : memref<1x8x196xf32, #tpu.memory_space<vmem>>, vector<1x8x14xf32>
    %109 = vector.shape_cast %108 : vector<1x8x14xf32> to vector<8x14xf32>
    %110 = vector.shape_cast %107 : vector<8x14xf32> to vector<1x8x14xf32>
    tpu.vector_store %arg4[%c0_75, %c0_76, %c182], %110 {strides = array<i32>} : memref<1x8x196xf32, #tpu.memory_space<vmem>>, vector<1x8x14xf32>,
    return
  }
  func.func @transform_0(%arg0: i32, %arg1: i32) -> (i32, i32, i32) {
    %c0_i32 = arith.constant 0 : i32
    %c0_i32_0 = arith.constant 0 : i32
    %c0_i32_1 = arith.constant 0 : i32
    return %arg0, %c0_i32, %c0_i32_0 : i32, i32, i32
  }
  func.func @transform_1(%arg0: i32, %arg1: i32) -> (i32, i32, i32) {
    %c0_i32 = arith.constant 0 : i32
    %c0_i32_0 = arith.constant 0 : i32
    %c0_i32_1 = arith.constant 0 : i32
    %c0_i32_2 = arith.constant 0 : i32
    return %c0_i32, %c0_i32_0, %c0_i32_1 : i32, i32, i32
  }
  func.func @transform_2(%arg0: i32, %arg1: i32) -> (i32, i32, i32) {
    %c0_i32 = arith.constant 0 : i32
    %c0_i32_0 = arith.constant 0 : i32
    return %arg0, %c0_i32, %arg1 : i32, i32, i32
  }
}

</mosaic_0001>

<bundles_post_ra>
// kernel: soft_channel_conv2d.1
= control target key start
LH: loop header
LB: loop body
LE: loop exit
PB: predicated region body
PF: predicated region fallthrough
CT: control target
= control target key end

     0   :  { %s1276_s9 = smov 0   ;;  %s1278_s10 = smov 0   ;;  %s1402_s0 = inlined_call_operand.vmem [shape: f32[2,4,256], index: 0, kind: input, shape index: {}]   ;;  %s1403_s1 = inlined_call_operand.vmem [shape: f32[9,8,4], index: 1, kind: input, shape index: {}]   ;;  %s1404_s2 = inlined_call_operand.vmem [shape: f32[2,8,196], index: 2, kind: output, shape index: {}]  }
   0x1   :  { %s1280_s11 = smov 0  }
   0x2 LB: > { %s24_s12 = sadd.s32 1, %s1236_s10  ;;  %p1130_p0 = scmp.ge.s32.totalorder %s1240_s11, 1  ;;  %s1240_s11 = sphi %s1280_s11, %s12_s11   ;;  %s1236_s10 = sphi %s1278_s10, %s1406_s10   ;;  %s1232_s9 = sphi %s1276_s9, %s1405_s9  }
   0x3   : > { %p26_p1 = scmp.ge.s32.totalorder %s24_s12, 2  ;;  %p126_p2 = scmp.lt.s32.totalorder %s1240_s11, 3 }
   0x5   : > { %s1408_s12 = smov (%p26_p1, %s24_s12), 0  ;;  %p127_p3 = pnand %p1130_p0, %p126_p2 }
   0x6   : > { %p152_p4 = scmp.lt.s32.totalorder (!%p127_p3), %s1232_s9, 1  ;;  %s1243_s17 = smov (!%p127_p3), 126  }
   0x7   : > { %130 = sbr.rel (%p127_p3) target bundleno = 496 (0x1f0), region = 28  ;;  %s1244_s18 = smov (!%p127_p3), 127  }
   0x8   : > { %s1245_s21 = smov (!%p127_p3), 112   ;;  %s1246_s22 = smov (!%p127_p3), 111  }
   0x9   : > { %s1247_s23 = smov (!%p127_p3), 110   ;;  %s1248_s24 = smov (!%p127_p3), 96  }
   0xa   : > { %s1249_s25 = smov (!%p127_p3), 95   ;;  %s1250_s26 = smov (!%p127_p3), 94  }
   0xb   : > { %s1253_s27 = smov (!%p127_p3), 122   ;;  %s1254_s28 = smov (!%p127_p3), 118  }
   0xc   : > { %s1410_s9 = smov (!%p152_p4, %s1232_s9), 1  ;;  %v1242_v0 = vmov 0.0   ;;  %vm183_vm0 = vcmask 1043456   ;;  %v168_v3 = vld [vmem:[%s1403_s1] sm:$0xff]  ;;  %vm179_vm1 = vcmask 31744   ;;  %vm437_vm2 = vcmask 916480  }
   0xd   : > { %330 = vmatprep.mubr.f32.mxu1 %v1242_v0  ;;  %252 = vmatprep.mubr.f32.mxu0 %v1242_v0  ;;  %s1172_s13 = sshll.u32 %s1410_s9, 3  ;;  %vm177_vm3 = vcmask 1039360   ;;  %vm346_vm4 = vcmask 1031168   ;;  %v1135_v10 = vld [vmem:[%s1403_s1 + $0x8] sm:$0xff]  ;;  %vm528_vm5 = vcmask 908288   ;;  %v1146_v13 = vld [vmem:[%s1403_s1 + $0x18] sm:$0xff] }
   0xe   : > { %s156_s16 = scalar_lea.vmem %s1402_s0, %s1172_s13  ;;  %v1142_v17 = vld [vmem:[%s1403_s1 + $0x10] sm:$0xff]  ;;  %vm619_vm6 = vcmask 900096   ;;  %v1150_v21 = vld [vmem:[%s1403_s1 + $0x20] sm:$0xff]  ;;  %v1154_v22 = vld [vmem:[%s1403_s1 + $0x28] sm:$0xff]  ;;  %vm710_vm7 = vcmask 785408   ;;  %vm801_vm8 = vcmask 777216  }
   0xf   : > { %v337_v1 = vld [vmem:[%s156_s16] sm:$0xff]  ;;  %v1158_v26 = vld [vmem:[%s1403_s1 + $0x30] sm:$0xff]  ;;  %v1162_v30 = vld [vmem:[%s1403_s1 + $0x38] sm:$0xff]  ;;  %vm892_vm9 = vcmask 769024   ;;  %s1173_s20 = sshll.u32 %s1410_s9, 4  ;;  %vm974_vm10 = vcmask 113664  }
  0x10   : > { %342 = vrot.lane.b32.xlu1 %v337_v1, %s1243_s17  ;;  %v341_v2 = vcombine.high %v337_v1, %v337_v1  ;;  %173 = vrot.lane.b32.xlu0 %v337_v1, %s1244_s18  ;;  %v1166_v34 = vld [vmem:[%s1403_s1 + $0x40] sm:$0xff]  ;;  %s1252_s9 = smov 120   ;;  %s1255_s29 = smov 108   ;;  %vm980_vm11 = vcmask 228464   ;;  %vm985_vm12 = vcmask 343264   ;;  %vm990_vm13 = vcmask 458064  }
  0x11   : > { %s1256_s30 = smov 116   ;;  %s1258_s3 = smov 114   ;;  %vm995_vm14 = vcmask 572864   ;;  %vm1023_vm15 = vcmask 97280  }
  0x12   : > { %1139 = vmatprep.subr.msk.mxu1 %vm183_vm0, %v341_v2  ;;  %s1259_s4 = smov 104   ;;  %s1260_s5 = smov 102  }
  0x13   : > { %1140 = vmatpush1.msk.msra.mxu1 %vm183_vm0, %v337_v1 }
  0x14   : > { %344 = vrot.lane.b32.xlu1 %v341_v2, %s1243_s17  ;;  %433 = vrot.lane.b32.xlu0 %v337_v1, %s1245_s21 }
  0x15   : > { %1141 = vmatmul.mubr.msk.f32.vlgmr.msra.gmra.mxu1 %vm179_vm1, %v168_v3 }
  0x16   : > { %510 = vmatprep.mubr.f32.mxu1 %v1242_v0 }
  0x18   : > { %435 = vrot.lane.b32.xlu1 %v341_v2, %s1245_s21  ;;  %175 = vrot.lane.b32.xlu0 %v341_v2, %s1244_s18 }
  0x1c   : > { %526 = vrot.lane.b32.xlu1 %v341_v2, %s1246_s22  ;;  %524 = vrot.lane.b32.xlu0 %v337_v1, %s1246_s22 }
  0x20   : > { %617 = vrot.lane.b32.xlu1 %v341_v2, %s1247_s23  ;;  %615 = vrot.lane.b32.xlu0 %v337_v1, %s1247_s23 }
  0x24   : > { %708 = vrot.lane.b32.xlu1 %v341_v2, %s1248_s24  ;;  %706 = vrot.lane.b32.xlu0 %v337_v1, %s1248_s24 }
  0x28   : > { %799 = vrot.lane.b32.xlu1 %v341_v2, %s1249_s25  ;;  %797 = vrot.lane.b32.xlu0 %v337_v1, %s1249_s25  ;;  %s1373_s25 = scalar_lea.vmem %s1404_s2, %s1173_s20 }
  0x2c   : > { %890 = vrot.lane.b32.xlu1 %v341_v2, %s1250_s26  ;;  %888 = vrot.lane.b32.xlu0 %v337_v1, %s1250_s26  ;;  %s1251_s26 = smov 124  }
  0x82   : > { %v343_v4 = vpop.permute.xlu1 %342  ;;  %v174_v5 = vpop.permute.xlu0 %173 }
  0x86   : > { %v345_v6 = vpop.permute.xlu1 %344  ;;  %v434_v7 = vpop.permute.xlu0 %433 }
  0x87   : > { %v347_v14 = vsel %vm346_vm4, %v343_v4, %v345_v6  ;;  %vm1010_vm4 = vcmask 917264  }
  0x8a   : > { %v436_v8 = vpop.permute.xlu1 %435  ;;  %v176_v9 = vpop.permute.xlu0 %175 }
  0x8b   : > { %v438_v11 = vsel %vm437_vm2, %v434_v7, %v436_v8  ;;  %1136 = vmatprep.subr.msk.mxu0 %vm183_vm0, %v176_v9  ;;  %1147 = vmatprep.subr.msk.mxu1 %vm183_vm0, %v436_v8  ;;  %v178_v12 = vsel %vm177_vm3, %v174_v5, %v176_v9  ;;  %vm1005_vm2 = vcmask 802464   ;;  %vm1033_vm3 = vcmask 326864  }
  0x8c   : > { %1137 = vmatpush1.msk.msra.mxu0 %vm183_vm0, %v178_v12  ;;  %1148 = vmatpush1.msk.msra.mxu1 %vm183_vm0, %v438_v11 }
  0x8d   : > { %1138 = vmatmul.mubr.msk.f32.vlgmr.msra.gmra.mxu0 %vm179_vm1, %v1135_v10  ;;  %1143 = vmatprep.subr.msk.mxu0 %vm183_vm0, %v345_v6 }
  0x8e   : > { %v527_v15 = vpop.permute.xlu1 %526  ;;  %1144 = vmatpush1.msk.msra.mxu0 %vm183_vm0, %v347_v14  ;;  %v525_v16 = vpop.permute.xlu0 %524  ;;  %419 = vmatprep.mubr.f32.mxu0 %v1242_v0 }
  0x8f   : > { %v529_v18 = vsel %vm528_vm5, %v525_v16, %v527_v15  ;;  %1151 = vmatprep.subr.msk.mxu0 %vm183_vm0, %v527_v15  ;;  %1149 = vmatmul.mubr.msk.f32.vlgmr.msra.gmra.mxu1 %vm179_vm1, %v1146_v13  ;;  %vm1038_vm5 = vcmask 441664  }
  0x90   : > { %692 = vmatprep.mubr.f32.mxu1 %v1242_v0 }
  0x91   : > { %1145 = vmatmul.mubr.msk.f32.vlgmr.msra.gmra.mxu0 %vm179_vm1, %v1142_v17 }
  0x92   : > { %1152 = vmatpush1.msk.msra.mxu0 %vm183_vm0, %v529_v18  ;;  %v618_v19 = vpop.permute.xlu1 %617  ;;  %v616_v20 = vpop.permute.xlu0 %615  ;;  %601 = vmatprep.mubr.f32.mxu0 %v1242_v0 }
  0x93   : > { %v620_v23 = vsel %vm619_vm6, %v616_v20, %v618_v19  ;;  %1155 = vmatprep.subr.msk.mxu1 %vm183_vm0, %v618_v19  ;;  %vm1016_vm6 = vcmask 1032064  }
  0x94   : > { %1156 = vmatpush1.msk.msra.mxu1 %vm183_vm0, %v620_v23 }
  0x95   : > { %1153 = vmatmul.mubr.msk.f32.vlgmr.msra.gmra.mxu0 %vm179_vm1, %v1150_v21  ;;  %1157 = vmatmul.mubr.msk.f32.vlgmr.msra.gmra.mxu1 %vm179_vm1, %v1154_v22 }
  0x96   : > { %v709_v24 = vpop.permute.xlu1 %708  ;;  %v707_v25 = vpop.permute.xlu0 %706  ;;  %783 = vmatprep.mubr.f32.mxu0 %v1242_v0  ;;  %874 = vmatprep.mubr.f32.mxu1 %v1242_v0 }
  0x97   : > { %v711_v27 = vsel %vm710_vm7, %v707_v25, %v709_v24  ;;  %1159 = vmatprep.subr.msk.mxu0 %vm183_vm0, %v709_v24  ;;  %vm1021_vm7 = vcmask 1048560  }
  0x98   : > { %1160 = vmatpush1.msk.msra.mxu0 %vm183_vm0, %v711_v27 }
  0x99   : > { %1161 = vmatmul.mubr.msk.f32.vlgmr.msra.gmra.mxu0 %vm179_vm1, %v1158_v26 }
  0x9a   : > { %v800_v28 = vpop.permute.xlu1 %799  ;;  %v798_v29 = vpop.permute.xlu0 %797  ;;  %965 = vmatprep.mubr.f32.mxu0 %v1242_v0 }
  0x9b   : > { %v802_v31 = vsel %vm801_vm8, %v798_v29, %v800_v28  ;;  %1163 = vmatprep.subr.msk.mxu1 %vm183_vm0, %v800_v28  ;;  %vm1043_vm8 = vcmask 556464  }
  0x9c   : > { %1164 = vmatpush1.msk.msra.mxu1 %vm183_vm0, %v802_v31 }
  0x9d   : > { %1165 = vmatmul.mubr.msk.f32.vlgmr.msra.gmra.mxu1 %vm179_vm1, %v1162_v30 }
  0x9e   : > { %v891_v32 = vpop.permute.xlu1 %890  ;;  %v889_v33 = vpop.permute.xlu0 %888 }
  0x9f   : > { %v893_v35 = vsel %vm892_vm9, %v889_v33, %v891_v32  ;;  %1167 = vmatprep.subr.msk.mxu0 %vm183_vm0, %v891_v32 }
  0xa0   : > { %1168 = vmatpush1.msk.msra.mxu0 %vm183_vm0, %v893_v35  ;;  %vm1000_vm0 = vcmask 687664  }
  0xa1   : > { %1169 = vmatmul.mubr.msk.f32.vlgmr.msra.gmra.mxu0 %vm179_vm1, %v1166_v34  ;;  %vm1028_vm1 = vcmask 212064  }
  0xd5   : > { %v332_v36 = vpop.f32.mrf.mxu1 }
  0xd7   : > { %v334_v37 = vpop.f32.mrf.mxu1 }
 0x14d   : > { %v254_v38 = vpop.f32.mrf.mxu0 }
 0x14e   : > { %v333_v39 = vadd.f32 %v332_v36, %v254_v38 }
 0x14f   : > { %v256_v40 = vpop.f32.mrf.mxu0  ;;  %v512_v41 = vpop.f32.mrf.mxu1 }
 0x150   : > { %v335_v43 = vadd.f32 %v334_v37, %v256_v40 }
 0x151   : > { %v421_v42 = vpop.f32.mrf.mxu0  ;;  %v514_v46 = vpop.f32.mrf.mxu1 }
 0x152   : > { %v426_v44 = vadd.f32 %v421_v42, %v333_v39 }
 0x153   : > { %v423_v45 = vpop.f32.mrf.mxu0 }
 0x154   : > { %v517_v47 = vadd.f32 %v512_v41, %v426_v44  ;;  %v427_v49 = vadd.f32 %v423_v45, %v335_v43 }
 0x155   : > { %v603_v48 = vpop.f32.mrf.mxu0  ;;  %v694_v52 = vpop.f32.mrf.mxu1 }
 0x156   : > { %v608_v50 = vadd.f32 %v603_v48, %v517_v47  ;;  %v518_v54 = vadd.f32 %v514_v46, %v427_v49 }
 0x157   : > { %v605_v51 = vpop.f32.mrf.mxu0  ;;  %v696_v55 = vpop.f32.mrf.mxu1 }
 0x158   : > { %v699_v53 = vadd.f32 %v694_v52, %v608_v50  ;;  %v609_v59 = vadd.f32 %v605_v51, %v518_v54 }
 0x159   : > { %v785_v56 = vpop.f32.mrf.mxu0 }
 0x15a   : > { %v790_v57 = vadd.f32 %v785_v56, %v699_v53  ;;  %v700_v63 = vadd.f32 %v696_v55, %v609_v59 }
 0x15b   : > { %v787_v60 = vpop.f32.mrf.mxu0 }
 0x15c   : > { %v791_v2 = vadd.f32 %v787_v60, %v700_v63 }
 0x15d   : > { %v876_v58 = vpop.f32.mrf.mxu1 }
 0x15e   : > { %v881_v61 = vadd.f32 %v876_v58, %v790_v57 }
 0x15f   : > { %v878_v1 = vpop.f32.mrf.mxu1 }
 0x160   : > { %v882_v4 = vadd.f32 %v878_v1, %v791_v2 }
 0x161   : > { %v967_v62 = vpop.f32.mrf.mxu0 }
 0x162   : > { %v972_v0 = vadd.f32 %v967_v62, %v881_v61 }
 0x163   : > { %v969_v3 = vpop.f32.mrf.mxu0 }
 0x164   : > { %982 = vrot.lane.b32.xlu1 %v972_v0, %s1251_s26  ;;  %977 = vrot.lane.b32.xlu0 %v972_v0, %s1243_s17  ;;  %975 = vst.msk [vmem:[%s1373_s25] sm:$0xff] %vm974_vm10, %v972_v0  ;;  %v973_v5 = vadd.f32 %v969_v3, %v882_v4  ;;  %s1257_s17 = smov 106  }
 0x168   : > { %992 = vrot.lane.b32.xlu1 %v972_v0, %s1252_s9  ;;  %987 = vrot.lane.b32.xlu0 %v972_v0, %s1253_s27 }
 0x16c   : > { %1018 = vrot.lane.b32.xlu1 %v973_v5, %s1247_s23  ;;  %997 = vrot.lane.b32.xlu0 %v972_v0, %s1254_s28 }
 0x170   : > { %1025 = vrot.lane.b32.xlu1 %v973_v5, %s1255_s29  ;;  %1002 = vrot.lane.b32.xlu0 %v972_v0, %s1256_s30 }
 0x174   : > { %1030 = vrot.lane.b32.xlu1 %v973_v5, %s1257_s17  ;;  %1007 = vrot.lane.b32.xlu0 %v972_v0, %s1258_s3 }
 0x178   : > { %1035 = vrot.lane.b32.xlu1 %v973_v5, %s1259_s4  ;;  %1013 = vrot.lane.b32.xlu0 %v973_v5, %s1245_s21 }
 0x17c   : > { %1040 = vrot.lane.b32.xlu0 %v973_v5, %s1260_s5 }
 0x1d6   : > { %v983_v6 = vpop.permute.xlu1 %982  ;;  %v978_v7 = vpop.permute.xlu0 %977 }
 0x1d7   : > { %981 = vst.msk [vmem:[%s1373_s25] sm:$0xff] %vm980_vm11, %v978_v7 }
 0x1d8   : > { %986 = vst.msk [vmem:[%s1373_s25] sm:$0xff] %vm985_vm12, %v983_v6 }
 0x1da   : > { %v993_v8 = vpop.permute.xlu1 %992  ;;  %v988_v9 = vpop.permute.xlu0 %987 }
 0x1db   : > { %991 = vst.msk [vmem:[%s1373_s25] sm:$0xff] %vm990_vm13, %v988_v9 }
 0x1dc   : > { %996 = vst.msk [vmem:[%s1373_s25] sm:$0xff] %vm995_vm14, %v993_v8 }
 0x1de   : > { %v1019_v10 = vpop.permute.xlu1 %1018  ;;  %v998_v11 = vpop.permute.xlu0 %997 }
 0x1df   : > { %1024 = vst.msk [vmem:[%s1373_s25 + $0x8] sm:$0xff] %vm1023_vm15, %v1019_v10 }
 0x1e0   : > { %1001 = vst.msk [vmem:[%s1373_s25] sm:$0xff] %vm1000_vm0, %v998_v11 }
 0x1e2   : > { %v1026_v12 = vpop.permute.xlu1 %1025  ;;  %v1003_v13 = vpop.permute.xlu0 %1002 }
 0x1e3   : > { %1029 = vst.msk [vmem:[%s1373_s25 + $0x8] sm:$0xff] %vm1028_vm1, %v1026_v12 }
 0x1e4   : > { %1006 = vst.msk [vmem:[%s1373_s25] sm:$0xff] %vm1005_vm2, %v1003_v13 }
 0x1e6   : > { %v1031_v14 = vpop.permute.xlu1 %1030  ;;  %v1008_v15 = vpop.permute.xlu0 %1007 }
 0x1e7   : > { %1034 = vst.msk [vmem:[%s1373_s25 + $0x8] sm:$0xff] %vm1033_vm3, %v1031_v14 }
 0x1e8   : > { %1011 = vst.msk [vmem:[%s1373_s25] sm:$0xff] %vm1010_vm4, %v1008_v15 }
 0x1ea   : > { %v1036_v16 = vpop.permute.xlu1 %1035  ;;  %v1014_v17 = vpop.permute.xlu0 %1013 }
 0x1eb   : > { %1039 = vst.msk [vmem:[%s1373_s25 + $0x8] sm:$0xff] %vm1038_vm5, %v1036_v16 }
 0x1ec   : > { %1017 = vst.msk [vmem:[%s1373_s25] sm:$0xff] %vm1016_vm6, %v1014_v17 }
 0x1ed   : > { %1022 = vst.msk [vmem:[%s1373_s25] sm:$0xff] %vm1021_vm7, %v1019_v10 }
 0x1ee   : > { %v1041_v18 = vpop.permute.xlu0 %1040 }
 0x1ef   : > { %1044 = vst.msk [vmem:[%s1373_s25 + $0x8] sm:$0xff] %vm1043_vm8, %v1041_v18 }
 0x1f0 PF: > { %s12_s11 = sadd.s32 1, %s1240_s11   ;;  %s1405_s9 = smov %s1236_s10 }
 0x1f1   : > { %p9_p5 = scmp.ge.s32.totalorder %s12_s11, 4   ;;  %s1406_s10 = smov %s1408_s12 }
 0x1f3   :  { %11 = sbr.rel (!%p9_p5) target bundleno = 2 (0x2), region = 66 }

</bundles_post_ra>
